<compile_context>
chip_gen: v6e
topology: v6e:2x2x1
jax: 0.10.0
libtpu: 0.0.40
codegen_flags: <defaults>
</compile_context>

<pallas_src>
import functools

import numpy as np
import jax
import jax.numpy as jnp
from jax.experimental import pallas as pl
from jax.experimental.pallas import tpu as pltpu

# ---- model hyper-parameters (the "args" of the PyTorch module) --------------
DIM = 32          # args.dim
N_LAYER = 2       # args.n_layer
AGG = "sum"       # args.agg
N_ENTITY = 50
N_RELATION = 10
B = 2             # batch
T = 8             # triples per entity (neighbor set size)


# ---------------------------------------------------------------------------
# Fused kernel: gather + attention MLP + group softmax + aggregation + score
#   groups g = (side, layer, batch-row), rows r = g*T + t
# ---------------------------------------------------------------------------
def _ckan_fused_kernel(idx_ref, table_ref, w_ref, st_ref, agg_ref, out_ref):
    d = w_ref.shape[1]            # embedding dim
    r = st_ref.shape[1]           # rows that go through the attention MLP
    b = out_ref.shape[0]          # batch
    nvocab = table_ref.shape[0]   # 2*N_ENTITY + N_RELATION
    rb = idx_ref.shape[0]         # r + b

    # --- fused multi-hot gather: ONE MXU push yields [h | r | t] per triple
    #     row and [item | 0 | 0] for the trailing b item-origin rows.
    idx = idx_ref[...]                                            # (rb, 3) i32
    cols = jax.lax.broadcasted_iota(jnp.int32, (rb, nvocab), 1)
    hot = ((cols == idx[:, 0:1]) | (cols == idx[:, 1:2])
           | (cols == idx[:, 2:3])).astype(jnp.float32)
    # NOTE: out-of-range indices silently gather a zero row (jnp.take clamps).
    gathered = jnp.dot(hot, table_ref[...],
                       preferred_element_type=jnp.float32)        # (rb, 3d)

    hr = gathered[:r, :2 * d]               # (r, 2d): [h ; r] already concat
    h_att = gathered[:r, :d]                # (r, d)
    t_att = gathered[:r, 2 * d:3 * d]       # (r, d)
    item_origin = gathered[r:, :d]          # (b, d)

    # --- attention MLP over all (side, layer, batch, neighbor) rows at once.
    w1 = w_ref[0:2 * d, :]
    w2 = w_ref[2 * d:3 * d, :]
    w3 = w_ref[3 * d:3 * d + 1, :]          # Linear(D,1) as a row vector
    z1 = jnp.maximum(jnp.dot(hr, w1, preferred_element_type=jnp.float32), 0.0)
    z2 = jnp.maximum(jnp.dot(z1, w2, preferred_element_type=jnp.float32), 0.0)
    # Linear(D,1) + Sigmoid: VPU mul + lane reduce (no N=1 MXU matmul).
    logit = jax.nn.sigmoid(jnp.sum(z2 * w3, axis=-1, keepdims=True))   # (r,1)

    # --- group softmax + weighted tail sum + head-group sum: ONE ST @ X push.
    # logits are sigmoid outputs in [0,1], so exp without max-subtraction is
    # numerically safe and mathematically identical to softmax.
    e = jnp.exp(logit)                                                 # (r,1)
    x = jnp.concatenate([h_att, e * t_att, e], axis=-1)                # (r,2d+1)
    gx = jnp.dot(st_ref[...], x, preferred_element_type=jnp.float32)   # (G,2d+1)
    h_gsum = gx[:, :d]                                     # per-group head sums
    att_out = gx[:, d:2 * d] / gx[:, 2 * d:2 * d + 1]      # group-level divide

    # --- 'sum' aggregation: ONE (2b, 2G) x (2G, d) push.
    stacked = jnp.concatenate([h_gsum, att_out], axis=0)               # (2G,d)
    agg = jnp.dot(agg_ref[...], stacked, preferred_element_type=jnp.float32)
    e_u = agg[:b, :]
    e_v = item_origin + agg[b:, :]

    score = jax.nn.sigmoid(jnp.sum(e_u * e_v, axis=-1, keepdims=True))  # (b,1)

    # --- single lane-dense (b, 128) output slab: [e_u | e_v | score | pad].
    pad = jnp.zeros((b, out_ref.shape[1] - 2 * d - 1), jnp.float32)
    out_ref[...] = jnp.concatenate([e_u, e_v, score, pad], axis=-1)


def _host_matrices(b, t, n_layer):
    """Host-built constant matrices: group-sum operator + fused aggregation."""
    g = 2 * n_layer * b
    r = g * t
    st = (np.arange(g)[:, None] == (np.arange(r) // t)[None, :]).astype(np.float32)
    gi = np.arange(g)
    layer = gi // b
    batch = gi % b
    eye_b = (batch[None, :] == np.arange(b)[:, None])                   # (B,G)
    mean_u = (eye_b & (layer[None, :] == 0)).astype(np.float32) / t
    m_u = (eye_b & (layer[None, :] < n_layer)).astype(np.float32)
    mean_v0 = (eye_b & (layer[None, :] == n_layer)).astype(np.float32) / t
    m_v = (eye_b & (layer[None, :] >= n_layer)).astype(np.float32)
    agg = np.block([[mean_u, m_u], [mean_v0, m_v]])                     # (2B,2G)
    return st, agg


# ---------------------------------------------------------------------------
# Forward (mode='predict' -> calc_score -> build_train -> predict, agg='sum')
# ---------------------------------------------------------------------------
@jax.jit
def calc_score_pallas(params, items, user_ts, item_ts):
    assert AGG == "sum"  # TODO(synk): 'pool'/'concat' aggregators not kernelized
    b = items.shape[0]
    t = user_ts[0][0].shape[1]
    d = DIM
    g = 2 * N_LAYER * b
    r = g * t

    def stack_idx(lst):
        return jnp.concatenate(
            [lst[i].reshape(-1) for i in range(N_LAYER)]).astype(jnp.int32)

    # Row order: (side, layer, batch, neighbor) -> r = (layer_slot*b + bi)*t + ti
    h_idx = jnp.concatenate([stack_idx(user_ts[0]), stack_idx(item_ts[0])])
    r_idx = jnp.concatenate([stack_idx(user_ts[1]), stack_idx(item_ts[1])])
    t_idx = jnp.concatenate([stack_idx(user_ts[2]), stack_idx(item_ts[2])])

    # Packed index array: col0 -> head block, col1 -> relation block,
    # col2 -> tail block; item-origin rows use -1 sentinels (never match).
    neg = jnp.full((b,), -1, jnp.int32)
    col_h = jnp.concatenate([h_idx, items.astype(jnp.int32).reshape(-1)])
    col_r = jnp.concatenate([r_idx + N_ENTITY, neg])
    col_t = jnp.concatenate([t_idx + N_ENTITY + N_RELATION, neg])
    idx = jnp.stack([col_h, col_r, col_t], axis=-1)            # (r+b, 3)

    # Block-diagonal gather table: [ent ⊕ rel ⊕ ent] of shape (110, 3d).
    ent = params["entity_emb"]
    rel = params["relation_emb"]
    zde = jnp.zeros((N_ENTITY, d), jnp.float32)
    zdr = jnp.zeros((N_RELATION, d), jnp.float32)
    table = jnp.concatenate([
        jnp.concatenate([ent, zde, zde], axis=1),
        jnp.concatenate([zdr, rel, zdr], axis=1),
        jnp.concatenate([zde, zde, ent], axis=1),
    ], axis=0)                                                  # (2*NE+NR, 3d)

    # Weight slab: [W1 (2d,d); W2 (d,d); w3 row (1,d)] -> (3d+1, d).
    wslab = jnp.concatenate(
        [params["w1"], params["w2"], params["w3"].reshape(1, d)], axis=0)

    st_np, agg_np = _host_matrices(b, t, N_LAYER)

    flops = 2 * ((r + b) * table.shape[0] * 3 * d      # gather
                 + r * 2 * d * d + r * d * d           # MLP
                 + g * r * (2 * d + 1)                 # ST @ X
                 + 2 * b * 2 * g * d)                  # aggregation
    bytes_accessed = 4 * (idx.size + table.size + wslab.size
                          + st_np.size + agg_np.size + b * 128)

    vmem = pl.BlockSpec(memory_space=pltpu.MemorySpace.VMEM)
    out = pl.pallas_call(
        _ckan_fused_kernel,
        out_shape=jax.ShapeDtypeStruct((b, 128), jnp.float32),
        in_specs=[vmem] * 5,
        out_specs=vmem,
        cost_estimate=pl.CostEstimate(flops=flops,
                                      transcendentals=2 * r + b,
                                      bytes_accessed=bytes_accessed),
    )(idx, table, wslab, jnp.asarray(st_np), jnp.asarray(agg_np))

    e_u = out[:, :d]
    e_v = out[:, d:2 * d]
    scores = out[:, 2 * d]
    return scores, e_v, e_u


# ---------------------------------------------------------------------------
# Parameter init (deterministic, xavier-uniform like the PyTorch __init__)
# ---------------------------------------------------------------------------
def xavier_uniform(key, shape, fan_in, fan_out):
    bound = (6.0 / (fan_in + fan_out)) ** 0.5
    return jax.random.uniform(key, shape, jnp.float32, -bound, bound)


def init_params(key):
    k = jax.random.split(key, 6)
    return {
        "entity_emb": xavier_uniform(k[0], (N_ENTITY, DIM), DIM, N_ENTITY),
        "relation_emb": xavier_uniform(k[1], (N_RELATION, DIM), DIM, N_RELATION),
        # transfer_matrix exists in __init__ but is only used in calc_kg_loss
        "transfer_matrix": xavier_uniform(k[2], (N_RELATION, DIM, DIM), DIM, DIM),
        # attention MLP weights stored as (in, out) so the kernel does x @ W
        "w1": xavier_uniform(k[3], (2 * DIM, DIM), 2 * DIM, DIM),
        "w2": xavier_uniform(k[4], (DIM, DIM), DIM, DIM),
        "w3": xavier_uniform(k[5], (DIM, 1), DIM, 1),
    }


# ---------------------------------------------------------------------------
# Pure-JAX reference (for correctness check against the Pallas path)
# ---------------------------------------------------------------------------
def calc_score_ref(params, items, user_ts, item_ts):
    ent, rel = params["entity_emb"], params["relation_emb"]
    w1, w2, w3 = params["w1"], params["w2"], params["w3"]
    emb_e = lambda idx: jnp.take(ent, idx, axis=0)
    emb_r = lambda idx: jnp.take(rel, idx, axis=0)

    def kattn(h, r, t):
        hr = jnp.concatenate([h, r], axis=-1)
        z = jax.nn.relu(hr @ w1)
        z = jax.nn.relu(z @ w2)
        att = jax.nn.sigmoid(z @ w3)[..., 0]          # (B, T)
        att = jax.nn.softmax(att, axis=-1)
        return jnp.sum(att[..., None] * t, axis=1)    # (B, D)

    user_embeddings = [emb_e(user_ts[0][0]).mean(axis=1)]
    for i in range(N_LAYER):
        user_embeddings.append(
            kattn(emb_e(user_ts[0][i]), emb_r(user_ts[1][i]),
                  emb_e(user_ts[2][i])))
    item_embeddings = [emb_e(items)]
    for i in range(N_LAYER):
        item_embeddings.append(
            kattn(emb_e(item_ts[0][i]), emb_r(item_ts[1][i]),
                  emb_e(item_ts[2][i])))
    if N_LAYER > 0 and AGG in ("sum", "pool"):
        item_embeddings.append(emb_e(item_ts[0][0]).mean(axis=1))
    e_u = functools.reduce(jnp.add, user_embeddings)
    e_v = functools.reduce(jnp.add, item_embeddings)
    return jax.nn.sigmoid(jnp.sum(e_v * e_u, axis=1)), e_v, e_u


if __name__ == "__main__":
    key = jax.random.PRNGKey(0)
    kp, kd = jax.random.split(key)
    params = init_params(kp)

    dks = jax.random.split(kd, 1 + 6 * N_LAYER)
    items = jax.random.randint(dks[0], (B,), 0, N_ENTITY)

    def make_triple_set(ks):
        heads, rels, tails = [], [], []
        for i in range(N_LAYER):
            heads.append(jax.random.randint(ks[3 * i + 0], (B, T), 0, N_ENTITY))
            rels.append(jax.random.randint(ks[3 * i + 1], (B, T), 0, N_RELATION))
            tails.append(jax.random.randint(ks[3 * i + 2], (B, T), 0, N_ENTITY))
        return [heads, rels, tails]

    user_ts = make_triple_set(dks[1:1 + 3 * N_LAYER])
    item_ts = make_triple_set(dks[1 + 3 * N_LAYER:1 + 6 * N_LAYER])

    scores, e_v, e_u = calc_score_pallas(params, items, user_ts, item_ts)
    jax.block_until_ready(scores)

    ref_scores, ref_ev, ref_eu = calc_score_ref(params, items, user_ts, item_ts)
    assert jnp.allclose(scores, ref_scores, atol=1e-4, rtol=1e-4), (scores, ref_scores)
    assert jnp.allclose(e_v, ref_ev, atol=1e-4, rtol=1e-4)
    assert jnp.allclose(e_u, ref_eu, atol=1e-4, rtol=1e-4)

    # TODO(synk): calc_kg_loss / calc_cf_loss (training losses) are left in plain
    # JAX-land; only the inference hot path (calc_score) is kernelized.
    print("KERNEL_OK")
</pallas_src>

<mosaic_0001>
module attributes {stable_mosaic.version = 11 : i64} {
  func.func @_ckan_fused_kernel(%arg0: memref<66x3xi32, #tpu.memory_space<vmem>>, %arg1: memref<110x96xf32, #tpu.memory_space<vmem>>, %arg2: memref<97x32xf32, #tpu.memory_space<vmem>>, %arg3: memref<8x64xf32, #tpu.memory_space<vmem>>, %arg4: memref<4x16xf32, #tpu.memory_space<vmem>>, %arg5: memref<2x128xf32, #tpu.memory_space<vmem>>) attributes {dimension_semantics = [], scalar_prefetch = 0 : i64, scratch_operands = 0 : i64, tpu.core_type = #tpu.core_type<tc>} {
    %c0 = arith.constant 0 : index
    %c0_0 = arith.constant 0 : index
    %0 = vector.load %arg0[%c0, %c0_0] : memref<66x3xi32, #tpu.memory_space<vmem>>, vector<66x3xi32>
    %1 = tpu.iota {dimensions = array<i32: 1>} : vector<66x110xi32>
    %2 = vector.extract_strided_slice %0 {offsets = [0, 0], sizes = [66, 1], strides = [1, 1]} : vector<66x3xi32> to vector<66x1xi32>
    %3 = vector.broadcast %2 : vector<66x1xi32> to vector<66x110xi32>
    %4 = arith.cmpi eq, %1, %3 : vector<66x110xi32>
    %5 = vector.extract_strided_slice %0 {offsets = [0, 1], sizes = [66, 1], strides = [1, 1]} : vector<66x3xi32> to vector<66x1xi32>
    %6 = vector.broadcast %5 : vector<66x1xi32> to vector<66x110xi32>
    %7 = arith.cmpi eq, %1, %6 : vector<66x110xi32>
    %8 = arith.ori %4, %7 : vector<66x110xi1>
    %9 = vector.extract_strided_slice %0 {offsets = [0, 2], sizes = [66, 1], strides = [1, 1]} : vector<66x3xi32> to vector<66x1xi32>
    %10 = vector.broadcast %9 : vector<66x1xi32> to vector<66x110xi32>
    %11 = arith.cmpi eq, %1, %10 : vector<66x110xi32>
    %12 = arith.ori %8, %11 : vector<66x110xi1>
    %13 = arith.extui %12 : vector<66x110xi1> to vector<66x110xi32>
    %14 = arith.sitofp %13 : vector<66x110xi32> to vector<66x110xf32>
    %c0_1 = arith.constant 0 : index
    %c0_2 = arith.constant 0 : index
    %15 = vector.load %arg1[%c0_1, %c0_2] : memref<110x96xf32, #tpu.memory_space<vmem>>, vector<110x96xf32>
    %cst = arith.constant dense<0.000000e+00> : vector<66x96xf32>
    %16 = tpu.matmul %14, %15, %cst {dimension_numbers = #tpu.dot_dimension_numbers<[1], [0], [0], [1], [0, 0, 1, 1], [], []>} : vector<66x110xf32>, vector<110x96xf32>, vector<66x96xf32> -> vector<66x96xf32>
    %17 = vector.extract_strided_slice %16 {offsets = [0, 0], sizes = [64, 64], strides = [1, 1]} : vector<66x96xf32> to vector<64x64xf32>
    %18 = vector.extract_strided_slice %16 {offsets = [0, 0], sizes = [64, 32], strides = [1, 1]} : vector<66x96xf32> to vector<64x32xf32>
    %19 = vector.extract_strided_slice %16 {offsets = [0, 64], sizes = [64, 32], strides = [1, 1]} : vector<66x96xf32> to vector<64x32xf32>
    %20 = vector.extract_strided_slice %16 {offsets = [64, 0], sizes = [2, 32], strides = [1, 1]} : vector<66x96xf32> to vector<2x32xf32>
    %c0_3 = arith.constant 0 : index
    %c0_4 = arith.constant 0 : index
    %21 = vector.load %arg2[%c0_3, %c0_4] : memref<97x32xf32, #tpu.memory_space<vmem>>, vector<64x32xf32>
    %c64 = arith.constant 64 : index
    %c0_5 = arith.constant 0 : index
    %22 = vector.load %arg2[%c64, %c0_5] : memref<97x32xf32, #tpu.memory_space<vmem>>, vector<32x32xf32>
    %c96 = arith.constant 96 : index
    %c0_6 = arith.constant 0 : index
    %23 = vector.load %arg2[%c96, %c0_6] : memref<97x32xf32, #tpu.memory_space<vmem>>, vector<1x32xf32>
    %cst_7 = arith.constant dense<0.000000e+00> : vector<64x32xf32>
    %24 = tpu.matmul %17, %21, %cst_7 {dimension_numbers = #tpu.dot_dimension_numbers<[1], [0], [0], [1], [0, 0, 1, 1], [], []>} : vector<64x64xf32>, vector<64x32xf32>, vector<64x32xf32> -> vector<64x32xf32>
    %cst_8 = arith.constant 0.000000e+00 : f32
    %25 = vector.broadcast %cst_8 : f32 to vector<64x32xf32>
    %26 = arith.maximumf %24, %25 : vector<64x32xf32>
    %cst_9 = arith.constant dense<0.000000e+00> : vector<64x32xf32>
    %27 = tpu.matmul %26, %22, %cst_9 {dimension_numbers = #tpu.dot_dimension_numbers<[1], [0], [0], [1], [0, 0, 1, 1], [], []>} : vector<64x32xf32>, vector<32x32xf32>, vector<64x32xf32> -> vector<64x32xf32>
    %cst_10 = arith.constant 0.000000e+00 : f32
    %28 = vector.broadcast %cst_10 : f32 to vector<64x32xf32>
    %29 = arith.maximumf %27, %28 : vector<64x32xf32>
    %30 = vector.broadcast %23 : vector<1x32xf32> to vector<64x32xf32>
    %31 = arith.mulf %29, %30 : vector<64x32xf32>
    %cst_11 = arith.constant dense<0.000000e+00> : vector<64xf32>
    %32 = vector.multi_reduction <add>, %31, %cst_11 [1] : vector<64x32xf32> to vector<64xf32>
    %33 = vector.shape_cast %32 : vector<64xf32> to vector<64x1xf32>
    %34 = arith.negf %33 : vector<64x1xf32>
    %35 = math.exp %34 : vector<64x1xf32>
    %cst_12 = arith.constant 1.000000e+00 : f32
    %36 = vector.broadcast %cst_12 : f32 to vector<64x1xf32>
    %37 = arith.addf %36, %35 : vector<64x1xf32>
    %38 = arith.divf %36, %37 : vector<64x1xf32>
    %39 = math.exp %38 : vector<64x1xf32>
    %40 = vector.broadcast %39 : vector<64x1xf32> to vector<64x32xf32>
    %41 = arith.mulf %40, %19 : vector<64x32xf32>
    %42 = tpu.concatenate %18, %41, %39 in 1 : vector<64x32xf32>, vector<64x32xf32>, vector<64x1xf32> -> vector<64x65xf32>
    %c0_13 = arith.constant 0 : index
    %c0_14 = arith.constant 0 : index
    %43 = vector.load %arg3[%c0_13, %c0_14] : memref<8x64xf32, #tpu.memory_space<vmem>>, vector<8x64xf32>
    %cst_15 = arith.constant dense<0.000000e+00> : vector<8x65xf32>
    %44 = tpu.matmul %43, %42, %cst_15 {dimension_numbers = #tpu.dot_dimension_numbers<[1], [0], [0], [1], [0, 0, 1, 1], [], []>} : vector<8x64xf32>, vector<64x65xf32>, vector<8x65xf32> -> vector<8x65xf32>
    %45 = vector.extract_strided_slice %44 {offsets = [0, 0], sizes = [8, 32], strides = [1, 1]} : vector<8x65xf32> to vector<8x32xf32>
    %46 = vector.extract_strided_slice %44 {offsets = [0, 32], sizes = [8, 32], strides = [1, 1]} : vector<8x65xf32> to vector<8x32xf32>
    %47 = vector.extract_strided_slice %44 {offsets = [0, 64], sizes = [8, 1], strides = [1, 1]} : vector<8x65xf32> to vector<8x1xf32>
    %48 = vector.broadcast %47 : vector<8x1xf32> to vector<8x32xf32>
    %49 = arith.divf %46, %48 : vector<8x32xf32>
    %50 = tpu.concatenate %45, %49 in 0 : vector<8x32xf32>, vector<8x32xf32> -> vector<16x32xf32>
    %c0_16 = arith.constant 0 : index
    %c0_17 = arith.constant 0 : index
    %51 = vector.load %arg4[%c0_16, %c0_17] : memref<4x16xf32, #tpu.memory_space<vmem>>, vector<4x16xf32>
    %cst_18 = arith.constant dense<0.000000e+00> : vector<4x32xf32>
    %52 = tpu.matmul %51, %50, %cst_18 {dimension_numbers = #tpu.dot_dimension_numbers<[1], [0], [0], [1], [0, 0, 1, 1], [], []>} : vector<4x16xf32>, vector<16x32xf32>, vector<4x32xf32> -> vector<4x32xf32>
    %53 = vector.extract_strided_slice %52 {offsets = [0, 0], sizes = [2, 32], strides = [1, 1]} : vector<4x32xf32> to vector<2x32xf32>
    %54 = vector.extract_strided_slice %52 {offsets = [2, 0], sizes = [2, 32], strides = [1, 1]} : vector<4x32xf32> to vector<2x32xf32>
    %55 = arith.addf %20, %54 : vector<2x32xf32>
    %56 = arith.mulf %53, %55 : vector<2x32xf32>
    %cst_19 = arith.constant dense<0.000000e+00> : vector<2xf32>
    %57 = vector.multi_reduction <add>, %56, %cst_19 [1] : vector<2x32xf32> to vector<2xf32>
    %58 = vector.shape_cast %57 : vector<2xf32> to vector<2x1xf32>
    %59 = arith.negf %58 : vector<2x1xf32>
    %60 = math.exp %59 : vector<2x1xf32>
    %cst_20 = arith.constant 1.000000e+00 : f32
    %61 = vector.broadcast %cst_20 : f32 to vector<2x1xf32>
    %62 = arith.addf %61, %60 : vector<2x1xf32>
    %63 = arith.divf %61, %62 : vector<2x1xf32>
    %cst_21 = arith.constant 0.000000e+00 : f32
    %64 = vector.broadcast %cst_21 : f32 to vector<2x63xf32>
    %65 = tpu.concatenate %53, %55, %63, %64 in 1 : vector<2x32xf32>, vector<2x32xf32>, vector<2x1xf32>, vector<2x63xf32> -> vector<2x128xf32>
    %c0_22 = arith.constant 0 : index
    %c0_23 = arith.constant 0 : index
    %66 = vector.load %arg5[%c0_22, %c0_23] : memref<2x128xf32, #tpu.memory_space<vmem>>, vector<2x128xf32>
    tpu.vector_store %arg5[%c0_22, %c0_23], %65 {strides = array<i32>} : memref<2x128xf32, #tpu.memory_space<vmem>>, vector<2x128xf32>,
    return
  }
}

</mosaic_0001>

<bundles_post_ra>
// kernel: calc_score_pallas.1
= control target key start
LH: loop header
LB: loop body
LE: loop exit
PB: predicated region body
PF: predicated region fallthrough
CT: control target
= control target key end

     0   :  { %v1289_v0 = vmov 2   ;;  %v1290_v1 = vmov 0   ;;  %vm217_vm0 = vcmask 1045504   ;;  %v1291_v3 = vmov 0.0   ;;  %s1296_s15 = smov 32   ;;  %s1651_s0 = inlined_call_operand.vmem [shape: s32[66,3], index: 0, kind: input, shape index: {}]   ;;  %s1652_s1 = inlined_call_operand.vmem [shape: f32[110,96], index: 1, kind: input, shape index: {}]   ;;  %s1653_s2 = inlined_call_operand.vmem [shape: f32[97,32], index: 2, kind: input, shape index: {}]   ;;  %s1654_s3 = inlined_call_operand.vmem [shape: f32[8,64], index: 3, kind: input, shape index: {}]   ;;  %s1655_s4 = inlined_call_operand.vmem [shape: f32[4,16], index: 4, kind: input, shape index: {}]   ;;  %s1656_s5 = inlined_call_operand.vmem [shape: f32[2,128], index: 5, kind: output, shape index: {}]  }
   0x1   :  { %1212 = vset.pattern.permute.xlu1 %v1289_v0  ;;  %1211 = vset.pattern.permute.xlu0 %v1290_v1  ;;  %v20_v2 = vld [vmem:[%s1651_s0] sm:$0xff]  ;;  %v188_v4 = vld [vmem:[%s1652_s1 + $0x68] sm:$0x3f]  ;;  %v186_v7 = vld [vmem:[%s1652_s1 + $0x58] sm:$0xff]  ;;  %v1292_v10 = vmov 1   ;;  %vm1293_vm1 = vmmov 0   ;;  %v29_v36 = vlaneseq }
   0x2   :  { %113 = vperm.xlu1 %1212, %v20_v2   ;;  %32 = vperm.xlu0 %1211, %v20_v2   ;;  %v21_v5 = vld [vmem:[%s1651_s0 + $0x8] sm:$0xff]  ;;  %v187_v6 = vld [vmem:[%s1652_s1 + $0x60] sm:$0xff]  ;;  %v22_v8 = vld [vmem:[%s1651_s0 + $0x10] sm:$0xff]  ;;  %vm189_vm10 = vcmask 900096  }
   0x3   :  { %1074 = vmatprep.subr.mxu0 %v1291_v3  ;;  %v185_v9 = vld [vmem:[%s1652_s1 + $0x50] sm:$0xff]  ;;  %v184_v11 = vld [vmem:[%s1652_s1 + $0x48] sm:$0xff]  ;;  %v183_v12 = vld [vmem:[%s1652_s1 + $0x40] sm:$0xff]  ;;  %1102 = vmatprep.mubr.msk.f32.mxu0 %vm1293_vm1, %v1291_v3  ;;  %v1447_v38 = vand.u32 127, %v29_v36 }
   0x4   :  { %1075 = vmatpush3.msk.msra.mxu0 %vm217_vm0, %v188_v4  ;;  %v23_v13 = vld [vmem:[%s1651_s0 + $0x18] sm:$0xff]  ;;  %v181_v15 = vld [vmem:[%s1652_s1 + $0x30] sm:$0xff]  ;;  %v24_v16 = vld [vmem:[%s1651_s0 + $0x20] sm:$0xff] }
   0x5   :  { %1076 = vmatprep.subr.mxu0 %v1291_v3  ;;  %v182_v14 = vld [vmem:[%s1652_s1 + $0x38] sm:$0xff]  ;;  %v180_v17 = vld [vmem:[%s1652_s1 + $0x28] sm:$0xff]  ;;  %v179_v18 = vld [vmem:[%s1652_s1 + $0x20] sm:$0xff] }
   0x6   :  { %1213 = vset.pattern.permute.xlu1 %v1290_v1  ;;  %1215 = vset.pattern.permute.xlu0 %v1289_v0  ;;  %v178_v19 = vld [vmem:[%s1652_s1 + $0x18] sm:$0xff]  ;;  %v25_v20 = vld [vmem:[%s1651_s0 + $0x28] sm:$0xff]  ;;  %v177_v21 = vld [vmem:[%s1652_s1 + $0x10] sm:$0xff] }
   0x7   :  { %35 = vperm.xlu1 %1213, %v21_v5   ;;  %116 = vperm.xlu0 %1215, %v21_v5   ;;  %v176_v22 = vld [vmem:[%s1652_s1 + $0x8] sm:$0xff]  ;;  %v26_v23 = vld [vmem:[%s1651_s0 + $0x30] sm:$0xff]  ;;  %v175_v24 = vld [vmem:[%s1652_s1] sm:$0xff] }
   0x8   :  { %1077 = vmatpush3.msra.mxu0 %v187_v6  ;;  %v27_v25 = vld [vmem:[%s1651_s0 + $0x38] sm:$0xff]  ;;  %v337_v27 = vld [vmem:[%s1653_s2 + $0x30] sm:$0xff]  ;;  %v336_v28 = vld [vmem:[%s1653_s2 + $0x28] sm:$0xff] }
   0x9   :  { %1078 = vmatprep.subr.mxu0 %v1291_v3  ;;  %v338_v26 = vld [vmem:[%s1653_s2 + $0x38] sm:$0xff]  ;;  %v335_v29 = vld [vmem:[%s1653_s2 + $0x20] sm:$0xff]  ;;  %v333_v31 = vld [vmem:[%s1653_s2 + $0x10] sm:$0xff] }
   0xa   :  { %1079 = vmatpush3.msra.mxu0 %v186_v7  ;;  %1129 = vmatprep.subr.mxu1 %v338_v26  ;;  %v334_v30 = vld [vmem:[%s1653_s2 + $0x18] sm:$0xff]  ;;  %v332_v4 = vld [vmem:[%s1653_s2 + $0x8] sm:$0xff] }
   0xb   :  { %1214 = vset.pattern.permute.xlu1 %v1292_v10  ;;  %119 = vperm.xlu0 %1215, %v22_v8   ;;  %v342_v6 = vld [vmem:[%s1653_s2 + $0x58] sm:$0xff] }
   0xc   :  { %71 = vperm.xlu1 %1214, %v21_v5   ;;  %1080 = vmatprep.subr.mxu0 %v1291_v3  ;;  %v331_v5 = vld [vmem:[%s1653_s2] sm:$0xff] }
   0xd   :  { %1081 = vmatpush3.msra.mxu0 %v185_v9  ;;  %1130 = vmatpush3.msra.mxu1 %v338_v26  ;;  %v339_v26 = vld [vmem:[%s1653_s2 + $0x40] sm:$0xff] }
   0xe   :  { %1082 = vmatprep.subr.mxu0 %v1291_v3  ;;  %1131 = vmatprep.subr.mxu1 %v337_v27 }
   0xf   :  { %1218 = vset.pattern.permute.xlu0 %v1292_v10  ;;  %1083 = vmatpush3.msra.mxu0 %v184_v11 }
  0x10   :  { %1216 = vset.pattern.permute.xlu1 %v1290_v1  ;;  %68 = vperm.xlu0 %1218, %v20_v2  }
  0x11   :  { %38 = vperm.xlu1 %1216, %v22_v8   ;;  %1084 = vmatprep.subr.mxu0 %v1291_v3 }
  0x12   :  { %1085 = vmatpush3.msra.mxu0 %v183_v12  ;;  %1132 = vmatpush3.msra.mxu1 %v337_v27 }
  0x13   :  { %1086 = vmatprep.subr.mxu0 %v1291_v3  ;;  %1133 = vmatprep.subr.mxu1 %v336_v28 }
  0x14   :  { %77 = vperm.xlu0 %1218, %v23_v13   ;;  %1087 = vmatpush3.msra.mxu0 %v182_v14 }
  0x15   :  { %1217 = vset.pattern.permute.xlu1 %v1292_v10  ;;  %1088 = vmatprep.subr.mxu0 %v1291_v3 }
  0x16   :  { %74 = vperm.xlu1 %1217, %v22_v8   ;;  %1089 = vmatpush3.msra.mxu0 %v181_v15 }
  0x17   :  { %1090 = vmatprep.subr.mxu0 %v1291_v3  ;;  %1134 = vmatpush3.msra.mxu1 %v336_v28 }
  0x18   :  { %80 = vperm.xlu0 %1218, %v24_v16   ;;  %1091 = vmatpush3.msra.mxu0 %v180_v17 }
  0x19   :  { %1092 = vmatprep.subr.mxu0 %v1291_v3  ;;  %1135 = vmatprep.subr.mxu1 %v335_v29 }
  0x1a   :  { %1219 = vset.pattern.permute.xlu1 %v1290_v1  ;;  %1093 = vmatpush3.msra.mxu0 %v179_v18 }
  0x1b   :  { %41 = vperm.xlu1 %1219, %v23_v13   ;;  %1094 = vmatprep.subr.mxu0 %v1291_v3 }
  0x1c   :  { %1223 = vset.pattern.permute.xlu0 %v1290_v1  ;;  %1095 = vmatpush3.msra.mxu0 %v178_v19 }
  0x1d   :  { %47 = vperm.xlu0 %1223, %v25_v20   ;;  %1096 = vmatprep.subr.mxu0 %v1291_v3 }
  0x1e   :  { %1097 = vmatpush3.msra.mxu0 %v177_v21  ;;  %1136 = vmatpush3.msra.mxu1 %v335_v29 }
  0x1f   :  { %1220 = vset.pattern.permute.xlu1 %v1289_v0  ;;  %1098 = vmatprep.subr.mxu0 %v1291_v3 }
  0x20   :  { %122 = vperm.xlu1 %1220, %v23_v13   ;;  %1099 = vmatpush3.msra.mxu0 %v176_v22 }
  0x21   :  { %50 = vperm.xlu0 %1223, %v26_v23   ;;  %1100 = vmatprep.subr.mxu0 %v1291_v3 }
  0x22   :  { %1101 = vmatpush3.msra.mxu0 %v175_v24  ;;  %1137 = vmatprep.subr.mxu1 %v334_v30  ;;  %v341_v24 = vld [vmem:[%s1653_s2 + $0x50] sm:$0xff] }
  0x23   :  { %1138 = vmatpush3.msra.mxu1 %v334_v30 }
  0x24   :  { %1221 = vset.pattern.permute.xlu1 %v1290_v1  ;;  %1139 = vmatprep.subr.mxu1 %v333_v31 }
  0x25   :  { %44 = vperm.xlu1 %1221, %v24_v16   ;;  %1227 = vset.pattern.permute.xlu0 %v1289_v0 }
  0x26   :  { %131 = vperm.xlu0 %1227, %v26_v23   ;;  %1140 = vmatpush3.msra.mxu1 %v333_v31 }
  0x27   :  { %1141 = vmatprep.subr.mxu1 %v332_v4 }
  0x28   :  { %1142 = vmatpush3.msra.mxu1 %v332_v4 }
  0x29   :  { %1222 = vset.pattern.permute.xlu1 %v1289_v0  ;;  %1143 = vmatprep.subr.mxu1 %v331_v5 }
  0x2a   :  { %125 = vperm.xlu1 %1222, %v24_v16   ;;  %134 = vperm.xlu0 %1227, %v27_v25  }
  0x2b   :  { %1144 = vmatpush3.msra.mxu1 %v331_v5 }
  0x2c   :  { %1157 = vmatprep.subr.mxu1 %v342_v6 }
  0x2e   :  { %1224 = vset.pattern.permute.xlu1 %v1292_v10  ;;  %1231 = vset.pattern.permute.xlu0 %v1290_v1 }
  0x2f   :  { %83 = vperm.xlu1 %1224, %v25_v20  }
  0x33   :  { %1225 = vset.pattern.permute.xlu1 %v1289_v0 }
  0x34   :  { %128 = vperm.xlu1 %1225, %v25_v20  }
  0x38   :  { %1226 = vset.pattern.permute.xlu1 %v1292_v10 }
  0x39   :  { %86 = vperm.xlu1 %1226, %v26_v23  }
  0x3d   :  { %1228 = vset.pattern.permute.xlu1 %v1290_v1 }
  0x3e   :  { %53 = vperm.xlu1 %1228, %v27_v25  }
  0x42   :  { %1229 = vset.pattern.permute.xlu1 %v1292_v10 }
  0x43   :  { %89 = vperm.xlu1 %1229, %v27_v25   ;;  %v340_v25 = vld [vmem:[%s1653_s2 + $0x48] sm:$0xff] }
  0x7d   :  { %v114_v32 = vpop.permute.xlu1 %113  ;;  %v33_v33 = vpop.permute.xlu0 %32 }
  0x7e   :  { %vm58_vm3 = vcmp.eq.s32.totalorder %v1447_v38, %v33_v33  ;;  %vm139_vm7 = vcmp.eq.s32.totalorder %v1447_v38, %v114_v32 }
  0x82   :  { %v36_v34 = vpop.permute.xlu1 %35  ;;  %v117_v35 = vpop.permute.xlu0 %116 }
  0x83   :  { %vm59_vm4 = vcmp.eq.s32.totalorder %v1447_v38, %v36_v34  ;;  %vm140_vm8 = vcmp.eq.s32.totalorder %v1447_v38, %v117_v35 }
  0x86   :  { %v120_v37 = vpop.permute.xlu0 %119 }
  0x87   :  { %v72_v39 = vpop.permute.xlu1 %71  ;;  %vm141_vm13 = vcmp.eq.s32.totalorder %v1447_v38, %v120_v37 }
  0x88   :  { %vm95_vm2 = vcmp.eq.s32.totalorder %v1447_v38, %v72_v39 }
  0x89   :  { %vm104_vm5 = vmor %vm59_vm4, %vm95_vm2 }
  0x8a   :  { %vm149_vm12 = vmor %vm104_vm5, %vm140_vm8 }
  0x8b   :  { %v69_v40 = vpop.permute.xlu0 %68  ;;  %v965_v44 = vsel %vm149_vm12, 1.0, %v1291_v3 }
  0x8c   :  { %vm94_vm6 = vcmp.eq.s32.totalorder %v1447_v38, %v69_v40  ;;  %v39_v41 = vpop.permute.xlu1 %38 }
  0x8d   :  { %vm103_vm9 = vmor %vm58_vm3, %vm94_vm6  ;;  %vm60_vm14 = vcmp.eq.s32.totalorder %v1447_v38, %v39_v41 }
  0x8e   :  { %vm148_vm11 = vmor %vm103_vm9, %vm139_vm7 }
  0x8f   :  { %v964_v42 = vsel %vm148_vm11, 1.0, %v1291_v3  ;;  %v78_v46 = vpop.permute.xlu0 %77 }
  0x90   :  { %1103 = vmatmul.mubr.msk.f32.vlgmr.msra.gmra.mxu0 %vm189_vm10, %v964_v42  ;;  %vm97_vm4 = vcmp.eq.s32.totalorder %v1447_v38, %v78_v46 }
  0x91   :  { %v75_v43 = vpop.permute.xlu1 %74  ;;  %1105 = vmatprep.mubr.msk.f32.mxu0 %vm1293_vm1, %v1291_v3 }
  0x92   :  { %vm96_vm15 = vcmp.eq.s32.totalorder %v1447_v38, %v75_v43 }
  0x93   :  { %vm105_vm0 = vmor %vm60_vm14, %vm96_vm15  ;;  %v81_v51 = vpop.permute.xlu0 %80 }
  0x94   :  { %vm150_vm2 = vmor %vm105_vm0, %vm141_vm13  ;;  %1106 = vmatmul.mubr.msk.f32.gmra.mxu0 %vm189_vm10, %v965_v44  ;;  %vm98_vm9 = vcmp.eq.s32.totalorder %v1447_v38, %v81_v51 }
  0x95   :  { %1108 = vmatprep.mubr.msk.f32.mxu0 %vm1293_vm1, %v1291_v3  ;;  %v966_v47 = vsel %vm150_vm2, 1.0, %v1291_v3 }
  0x96   :  { %v42_v45 = vpop.permute.xlu1 %41 }
  0x97   :  { %vm61_vm3 = vcmp.eq.s32.totalorder %v1447_v38, %v42_v45 }
  0x98   :  { %1109 = vmatmul.mubr.msk.f32.gmra.mxu0 %vm189_vm10, %v966_v47  ;;  %vm106_vm5 = vmor %vm61_vm3, %vm97_vm4  ;;  %v48_v53 = vpop.permute.xlu0 %47 }
  0x99   :  { %1111 = vmatprep.mubr.msk.f32.mxu0 %vm1293_vm1, %v1291_v3  ;;  %vm63_vm15 = vcmp.eq.s32.totalorder %v1447_v38, %v48_v53 }
  0x9b   :  { %v123_v48 = vpop.permute.xlu1 %122 }
  0x9c   :  { %vm142_vm6 = vcmp.eq.s32.totalorder %v1447_v38, %v123_v48  ;;  %v51_v56 = vpop.permute.xlu0 %50 }
  0x9d   :  { %vm151_vm7 = vmor %vm106_vm5, %vm142_vm6  ;;  %vm64_vm5 = vcmp.eq.s32.totalorder %v1447_v38, %v51_v56 }
  0x9e   :  { %v967_v49 = vsel %vm151_vm7, 1.0, %v1291_v3 }
  0x9f   :  { %1112 = vmatmul.mubr.msk.f32.gmra.mxu0 %vm189_vm10, %v967_v49 }
  0xa0   :  { %v45_v50 = vpop.permute.xlu1 %44  ;;  %1114 = vmatprep.mubr.msk.f32.mxu0 %vm1293_vm1, %v1291_v3 }
  0xa1   :  { %vm62_vm8 = vcmp.eq.s32.totalorder %v1447_v38, %v45_v50  ;;  %v132_v58 = vpop.permute.xlu0 %131 }
  0xa2   :  { %vm107_vm11 = vmor %vm62_vm8, %vm98_vm9  ;;  %vm145_vm4 = vcmp.eq.s32.totalorder %v1447_v38, %v132_v58 }
  0xa5   :  { %v126_v52 = vpop.permute.xlu1 %125  ;;  %v135_v63 = vpop.permute.xlu0 %134 }
  0xa6   :  { %vm143_vm12 = vcmp.eq.s32.totalorder %v1447_v38, %v126_v52 }
  0xa7   :  { %vm152_vm13 = vmor %vm107_vm11, %vm143_vm12  ;;  %vm146_vm12 = vcmp.eq.s32.totalorder %v1447_v38, %v135_v63 }
  0xa8   :  { %v968_v54 = vsel %vm152_vm13, 1.0, %v1291_v3 }
  0xa9   :  { %1115 = vmatmul.mubr.msk.f32.gmra.mxu0 %vm189_vm10, %v968_v54  ;;  %v999_v54 = vld [vmem:[%s1653_s2 + $0x60] ss:$0 sm:$0xff]  ;;  %s1294_s2 = smov 96  }
  0xaa   :  { %v84_v55 = vpop.permute.xlu1 %83  ;;  %1117 = vmatprep.mubr.msk.f32.mxu0 %vm1293_vm1, %v1291_v3 }
  0xab   :  { %vm99_vm14 = vcmp.eq.s32.totalorder %v1447_v38, %v84_v55 }
  0xac   :  { %vm108_vm0 = vmor %vm63_vm15, %vm99_vm14  ;;  %vm344_vm15 = vcmask 523264  }
  0xaf   :  { %v129_v57 = vpop.permute.xlu1 %128 }
  0xb0   :  { %vm144_vm2 = vcmp.eq.s32.totalorder %v1447_v38, %v129_v57 }
  0xb1   :  { %vm153_vm3 = vmor %vm108_vm0, %vm144_vm2  ;;  %vm482_vm0 = vcmask 261120  }
  0xb2   :  { %v969_v59 = vsel %vm153_vm3, 1.0, %v1291_v3 }
  0xb3   :  { %1118 = vmatmul.mubr.msk.f32.gmra.mxu0 %vm189_vm10, %v969_v59 }
  0xb4   :  { %v87_v60 = vpop.permute.xlu1 %86  ;;  %1120 = vmatprep.mubr.msk.f32.mxu0 %vm1293_vm1, %v1291_v3 }
  0xb5   :  { %vm100_vm6 = vcmp.eq.s32.totalorder %v1447_v38, %v87_v60 }
  0xb6   :  { %vm109_vm7 = vmor %vm64_vm5, %vm100_vm6  ;;  %vm862_vm6 = vcmask 130048  }
  0xb7   :  { %vm154_vm8 = vmor %vm109_vm7, %vm145_vm4  ;;  %vm957_vm7 = vcmask 531456  }
  0xb8   :  { %v970_v61 = vsel %vm154_vm8, 1.0, %v1291_v3 }
  0xb9   :  { %v54_v62 = vpop.permute.xlu1 %53  ;;  %1121 = vmatmul.mubr.msk.f32.gmra.mxu0 %vm189_vm10, %v970_v61 }
  0xba   :  { %1123 = vmatprep.mubr.msk.f32.mxu0 %vm1293_vm1, %v1291_v3  ;;  %vm65_vm9 = vcmp.eq.s32.totalorder %v1447_v38, %v54_v62 }
  0xbe   :  { %v90_v1 = vpop.permute.xlu1 %89 }
  0xbf   :  { %vm101_vm11 = vcmp.eq.s32.totalorder %v1447_v38, %v90_v1 }
  0xc0   :  { %vm110_vm13 = vmor %vm65_vm9, %vm101_vm11 }
  0xc1   :  { %vm155_vm14 = vmor %vm110_vm13, %vm146_vm12 }
  0xc2   :  { %v971_v2 = vsel %vm155_vm14, 1.0, %v1291_v3 }
  0xc3   :  { %1124 = vmatmul.mubr.msk.f32.gmra.mxu0 %vm189_vm10, %v971_v2 }
  0xc4   :  { %1126 = vmatprep.mubr.msk.f32.mxu0 %vm1293_vm1, %v1291_v3 }
 0x150   :  { %v1514_v7 = vpop.f32.mrf.mxu0 }
 0x151   :  { %1145 = vmatprep.mubr.msk.f32.mxu1 %vm344_vm15, %v1514_v7 }
 0x152   :  { %v1104_v8 = vpop.f32.mrf.mxu0 }
 0x154   :  { %v1518_v9 = vpop.f32.mrf.mxu0 }
 0x155   :  { %1146 = vmatmul.mubr.msk.f32.vlgmr.msra.gmra.mxu1 %vm344_vm15, %v1518_v9 }
 0x156   :  { %v1107_v11 = vpop.f32.mrf.mxu0  ;;  %1158 = vmatpush3.msra.mxu1 %v342_v6 }
 0x157   :  { %1159 = vmatprep.subr.mxu1 %v341_v24 }
 0x158   :  { %v1522_v12 = vpop.f32.mrf.mxu0  ;;  %1160 = vmatpush3.msra.mxu1 %v341_v24 }
 0x159   :  { %1148 = vmatprep.mubr.msk.f32.mxu1 %vm344_vm15, %v1522_v12  ;;  %1161 = vmatprep.subr.mxu1 %v340_v25 }
 0x15a   :  { %v1110_v13 = vpop.f32.mrf.mxu0  ;;  %1162 = vmatpush3.msra.mxu1 %v340_v25 }
 0x15b   :  { %1163 = vmatprep.subr.mxu1 %v339_v26 }
 0x15c   :  { %1164 = vmatpush3.msra.mxu1 %v339_v26 }
 0x15d   :  { %1177 = vmatprep.subr.mxu1 %v1291_v3 }
 0x15f   :  { %v1526_v14 = vpop.f32.mrf.mxu0 }
 0x160   :  { %1149 = vmatmul.mubr.msk.f32.gmra.mxu1 %vm344_vm15, %v1526_v14 }
 0x161   :  { %v1113_v15 = vpop.f32.mrf.mxu0 }
 0x169   :  { %v1530_v16 = vpop.f32.mrf.mxu0 }
 0x16a   :  { %1151 = vmatprep.mubr.msk.f32.mxu1 %vm344_vm15, %v1530_v16 }
 0x16b   :  { %v1116_v17 = vpop.f32.mrf.mxu0 }
 0x173   :  { %v1534_v18 = vpop.f32.mrf.mxu0 }
 0x174   :  { %1152 = vmatmul.mubr.msk.f32.gmra.mxu1 %vm344_vm15, %v1534_v18 }
 0x175   :  { %v1119_v19 = vpop.f32.mrf.mxu0 }
 0x179   :  { %v1538_v20 = vpop.f32.mrf.mxu0 }
 0x17a   :  { %1154 = vmatprep.mubr.msk.f32.mxu1 %vm344_vm15, %v1538_v20 }
 0x17b   :  { %v1122_v21 = vpop.f32.mrf.mxu0 }
 0x183   :  { %v1542_v22 = vpop.f32.mrf.mxu0 }
 0x184   :  { %1155 = vmatmul.mubr.msk.f32.gmra.mxu1 %vm344_vm15, %v1542_v22 }
 0x185   :  { %v1125_v23 = vpop.f32.mrf.mxu0 }
 0x215   :  { %v1147_v27 = vpop.f32.mrf.mxu1 }
 0x216   :  { %v475_v30 = vmax.f32 %v1147_v27, 0.0 }
 0x217   :  { %v435_v28 = vpop.f32.mrf.mxu1 }
 0x218   :  { %v474_v29 = vmax.f32 %v435_v28, 0.0 }
 0x21a   :  { %1165 = vmatprep.mubr.msk.f32.mxu1 %vm482_vm0, %v474_v29 }
 0x21b   :  { %1166 = vmatmul.mubr.msk.f32.vlgmr.msra.gmra.mxu1 %vm482_vm0, %v475_v30 }
 0x220   :  { %v1150_v31 = vpop.f32.mrf.mxu1 }
 0x221   :  { %v477_v34 = vmax.f32 %v1150_v31, 0.0 }
 0x222   :  { %v445_v32 = vpop.f32.mrf.mxu1 }
 0x223   :  { %v476_v33 = vmax.f32 %v445_v32, 0.0 }
 0x225   :  { %1168 = vmatprep.mubr.msk.f32.mxu1 %vm482_vm0, %v476_v33 }
 0x226   :  { %1169 = vmatmul.mubr.msk.f32.gmra.mxu1 %vm482_vm0, %v477_v34 }
 0x234   :  { %v1153_v35 = vpop.f32.mrf.mxu1 }
 0x235   :  { %v479_v39 = vmax.f32 %v1153_v35, 0.0 }
 0x236   :  { %v455_v36 = vpop.f32.mrf.mxu1 }
 0x237   :  { %v478_v37 = vmax.f32 %v455_v36, 0.0 }
 0x239   :  { %1171 = vmatprep.mubr.msk.f32.mxu1 %vm482_vm0, %v478_v37 }
 0x23a   :  { %1172 = vmatmul.mubr.msk.f32.gmra.mxu1 %vm482_vm0, %v479_v39 }
 0x244   :  { %v1156_v40 = vpop.f32.mrf.mxu1 }
 0x245   :  { %v481_v43 = vmax.f32 %v1156_v40, 0.0 }
 0x246   :  { %v465_v41 = vpop.f32.mrf.mxu1 }
 0x247   :  { %v480_v42 = vmax.f32 %v465_v41, 0.0 }
 0x249   :  { %1174 = vmatprep.mubr.msk.f32.mxu1 %vm482_vm0, %v480_v42 }
 0x24a   :  { %1175 = vmatmul.mubr.msk.f32.gmra.mxu1 %vm482_vm0, %v481_v43 }
 0x24b   :  { %1193 = vmatprep.mubr.msk.f32.mxu1 %vm1293_vm1, %v1291_v3 }
 0x2db   :  { %v1167_v44 = vpop.f32.mrf.mxu1 }
 0x2dc   :  { %v613_v6 = vmax.f32 %v1167_v44, 0.0 }
 0x2dd   :  { %v573_v45 = vpop.f32.mrf.mxu1 }
 0x2de   :  { %v612_v2 = vmax.f32 %v573_v45, 0.0  ;;  %v625_v19 = vmul.f32 %v999_v54, %v613_v6 }
 0x2e0   :  { %v624_v15 = vmul.f32 %v999_v54, %v612_v2  ;;  %v635_v23 = vsel %vm482_vm0, %v625_v19, 0.0 }
 0x2e2   :  { %v632_v21 = vsel %vm482_vm0, %v624_v15, 0.0 }
 0x2e6   :  { %v1170_v46 = vpop.f32.mrf.mxu1 }
 0x2e7   :  { %v615_v62 = vmax.f32 %v1170_v46, 0.0 }
 0x2e8   :  { %v583_v47 = vpop.f32.mrf.mxu1 }
 0x2e9   :  { %v614_v58 = vmax.f32 %v583_v47, 0.0  ;;  %v627_v11 = vmul.f32 %v999_v54, %v615_v62 }
 0x2eb   :  { %v626_v5 = vmul.f32 %v999_v54, %v614_v58  ;;  %v641_v17 = vsel %vm482_vm0, %v627_v11, 0.0 }
 0x2ed   :  { %v638_v13 = vsel %vm482_vm0, %v626_v5, 0.0 }
 0x2fa   :  { %v1173_v48 = vpop.f32.mrf.mxu1 }
 0x2fb   :  { %v617_v55 = vmax.f32 %v1173_v48, 0.0 }
 0x2fc   :  { %v593_v49 = vpop.f32.mrf.mxu1 }
 0x2fd   :  { %v616_v51 = vmax.f32 %v593_v49, 0.0  ;;  %v629_v1 = vmul.f32 %v999_v54, %v617_v55 }
 0x2ff   :  { %v628_v61 = vmul.f32 %v999_v54, %v616_v51  ;;  %v647_v8 = vsel %vm482_vm0, %v629_v1, 0.0 }
 0x301   :  { %v644_v4 = vsel %vm482_vm0, %v628_v61, 0.0 }
 0x30a   :  { %v1176_v50 = vpop.f32.mrf.mxu1 }
 0x30b   :  { %v619_v52 = vmax.f32 %v1176_v50, 0.0 }
 0x30c   :  { %v603_v53 = vpop.f32.mrf.mxu1 }
 0x30d   :  { %v618_v56 = vmax.f32 %v603_v53, 0.0  ;;  %v631_v57 = vmul.f32 %v999_v54, %v619_v52 }
 0x30f   :  { %v653_v59 = vsel %vm482_vm0, %v631_v57, 0.0  ;;  %v630_v60 = vmul.f32 %v999_v54, %v618_v56 }
 0x310   :  { %654 = vadd.xlane.f32.xlu1 %v653_v59 }
 0x311   :  { %v650_v63 = vsel %vm482_vm0, %v630_v60, 0.0 }
 0x312   :  { %651 = vadd.xlane.f32.xlu0 %v650_v63 }
 0x314   :  { %645 = vadd.xlane.f32.xlu1 %v644_v4 }
 0x316   :  { %648 = vadd.xlane.f32.xlu0 %v647_v8 }
 0x318   :  { %639 = vadd.xlane.f32.xlu1 %v638_v13 }
 0x31a   :  { %642 = vadd.xlane.f32.xlu0 %v641_v17 }
 0x31c   :  { %633 = vadd.xlane.f32.xlu1 %v632_v21 }
 0x31e   :  { %636 = vadd.xlane.f32.xlu0 %v635_v23 }
 0x399   :  { %v655_v24 = vpop.xlane.xlu1 %654 }
 0x39a   :  { %v1007_v25 = vmul.f32 -1.442695, %v655_v24 }
 0x39b   :  { %v652_v26 = vpop.xlane.xlu0 %651 }
 0x39c   :  { %1235 = vpow2.f32 %v1007_v25  ;;  %v1006_v27 = vmul.f32 -1.442695, %v652_v26 }
 0x39d   :  { %v646_v28 = vpop.xlane.xlu1 %645 }
 0x39e   :  { %1237 = vpow2.f32 %v1006_v27  ;;  %v1004_v29 = vmul.f32 -1.442695, %v646_v28 }
 0x39f   :  { %v649_v30 = vpop.xlane.xlu0 %648 }
 0x3a0   :  { %1239 = vpow2.f32 %v1004_v29  ;;  %v1005_v31 = vmul.f32 -1.442695, %v649_v30 }
 0x3a1   :  { %v640_v32 = vpop.xlane.xlu1 %639 }
 0x3a2   :  { %1241 = vpow2.f32 %v1005_v31  ;;  %v1002_v33 = vmul.f32 -1.442695, %v640_v32  ;;  %v1295_v31 = vmov 64  }
 0x3a3   :  { %v643_v34 = vpop.xlane.xlu0 %642  ;;  %1230 = vset.pattern.permute.xlu1 %v1295_v31 }
 0x3a4   :  { %1243 = vpow2.f32 %v1002_v33  ;;  %v1003_v35 = vmul.f32 -1.442695, %v643_v34 }
 0x3a5   :  { %v634_v36 = vpop.xlane.xlu1 %633 }
 0x3a6   :  { %1245 = vpow2.f32 %v1003_v35  ;;  %v1000_v37 = vmul.f32 -1.442695, %v634_v36 }
 0x3a7   :  { %v637_v39 = vpop.xlane.xlu0 %636 }
 0x3a8   :  { %1247 = vpow2.f32 %v1000_v37  ;;  %v1001_v40 = vmul.f32 -1.442695, %v637_v39 }
 0x3a9   :  { %v1236_v41 = vpop.eup %1235 }
 0x3aa   :  { %v687_v42 = vadd.f32 1.0, %v1236_v41  ;;  %1249 = vpow2.f32 %v1001_v40 }
 0x3ab   :  { %v1238_v43 = vpop.eup %1237 }
 0x3ac   :  { %1251 = vrcp.f32 %v687_v42  ;;  %v686_v44 = vadd.f32 1.0, %v1238_v43 }
 0x3ad   :  { %v1240_v45 = vpop.eup %1239 }
 0x3ae   :  { %1253 = vrcp.f32 %v686_v44  ;;  %v684_v46 = vadd.f32 1.0, %v1240_v45 }
 0x3af   :  { %v1242_v47 = vpop.eup %1241 }
 0x3b0   :  { %1255 = vrcp.f32 %v684_v46  ;;  %v685_v48 = vadd.f32 1.0, %v1242_v47 }
 0x3b1   :  { %v1244_v49 = vpop.eup %1243 }
 0x3b2   :  { %1257 = vrcp.f32 %v685_v48  ;;  %v682_v50 = vadd.f32 1.0, %v1244_v49 }
 0x3b3   :  { %v1246_v51 = vpop.eup %1245 }
 0x3b4   :  { %1259 = vrcp.f32 %v682_v50  ;;  %v683_v52 = vadd.f32 1.0, %v1246_v51 }
 0x3b5   :  { %v1248_v53 = vpop.eup %1247 }
 0x3b6   :  { %1261 = vrcp.f32 %v683_v52  ;;  %v680_v54 = vadd.f32 1.0, %v1248_v53 }
 0x3b7   :  { %v1250_v55 = vpop.eup %1249 }
 0x3b8   :  { %1263 = vrcp.f32 %v680_v54  ;;  %v681_v56 = vadd.f32 1.0, %v1250_v55  ;;  %v776_v55 = vld [vmem:[%s1654_s3] sm:$0xff] }
 0x3b9   :  { %v1252_v57 = vpop.eup %1251 }
 0x3ba   :  { %v718_v58 = vmul.f32 1.442695, %v1252_v57  ;;  %1265 = vrcp.f32 %v681_v56 }
 0x3bb   :  { %v1254_v59 = vpop.eup %1253 }
 0x3bc   :  { %1267 = vpow2.f32 %v718_v58  ;;  %v716_v60 = vmul.f32 1.442695, %v1254_v59 }
 0x3bd   :  { %v1256_v61 = vpop.eup %1255 }
 0x3be   :  { %1269 = vpow2.f32 %v716_v60  ;;  %v712_v62 = vmul.f32 1.442695, %v1256_v61 }
 0x3bf   :  { %v1258_v63 = vpop.eup %1257 }
 0x3c0   :  { %1271 = vpow2.f32 %v712_v62  ;;  %v714_v1 = vmul.f32 1.442695, %v1258_v63 }
 0x3c1   :  { %v1260_v2 = vpop.eup %1259 }
 0x3c2   :  { %1273 = vpow2.f32 %v714_v1  ;;  %v708_v4 = vmul.f32 1.442695, %v1260_v2  ;;  %v861_v1 = vld [vmem:[%s1655_s4] sm:$0xf] }
 0x3c3   :  { %v1262_v5 = vpop.eup %1261 }
 0x3c4   :  { %1275 = vpow2.f32 %v708_v4  ;;  %v710_v6 = vmul.f32 1.442695, %v1262_v5 }
 0x3c5   :  { %v1264_v8 = vpop.eup %1263 }
 0x3c6   :  { %1277 = vpow2.f32 %v710_v6  ;;  %v704_v11 = vmul.f32 1.442695, %v1264_v8 }
 0x3c7   :  { %v1266_v13 = vpop.eup %1265 }
 0x3c8   :  { %1279 = vpow2.f32 %v704_v11  ;;  %v706_v15 = vmul.f32 1.442695, %v1266_v13 }
 0x3c9   :  { %v1268_v17 = vpop.eup %1267 }
 0x3ca   :  { %1281 = vpow2.f32 %v706_v15  ;;  %v727_v19 = vmul.f32 %v1268_v17, %v1542_v22 }
 0x3cb   :  { %v1270_v21 = vpop.eup %1269 }
 0x3cc   :  { %750 = vrot.lane.b32.xlu0 %v727_v19, %s1294_s2  ;;  %v726_v23 = vmul.f32 %v1270_v21, %v1538_v20 }
 0x3cd   :  { %v1272_v24 = vpop.eup %1271 }
 0x3ce   :  { %748 = vrot.lane.b32.xlu1 %v726_v23, %s1294_s2  ;;  %v724_v25 = vmul.f32 %v1272_v24, %v1530_v16 }
 0x3cf   :  { %v1274_v26 = vpop.eup %1273 }
 0x3d0   :  { %744 = vrot.lane.b32.xlu0 %v724_v25, %s1294_s2  ;;  %v725_v27 = vmul.f32 %v1274_v26, %v1534_v18 }
 0x3d1   :  { %v1276_v28 = vpop.eup %1275 }
 0x3d2   :  { %746 = vrot.lane.b32.xlu1 %v725_v27, %s1294_s2  ;;  %v722_v29 = vmul.f32 %v1276_v28, %v1522_v12 }
 0x3d3   :  { %v1278_v30 = vpop.eup %1277 }
 0x3d4   :  { %740 = vrot.lane.b32.xlu0 %v722_v29, %s1294_s2  ;;  %v723_v32 = vmul.f32 %v1278_v30, %v1526_v14 }
 0x3d5   :  { %v1280_v33 = vpop.eup %1279 }
 0x3d6   :  { %742 = vrot.lane.b32.xlu1 %v723_v32, %s1294_s2  ;;  %v720_v34 = vmul.f32 %v1280_v33, %v1514_v7 }
 0x3d7   :  { %v1282_v35 = vpop.eup %1281 }
 0x3d8   :  { %736 = vrot.lane.b32.xlu0 %v720_v34, %s1294_s2  ;;  %v721_v36 = vmul.f32 %v1282_v35, %v1518_v9 }
 0x3da   :  { %738 = vrot.lane.b32.xlu1 %v721_v36, %s1294_s2 }
 0x43e   :  { %v751_v37 = vpop.permute.xlu0 %750 }
 0x43f   :  { %v767_v39 = vsel %vm482_vm0, %v1542_v22, %v751_v37 }
 0x440   :  { %v749_v40 = vpop.permute.xlu1 %748  ;;  %v775_v41 = vsel %vm344_vm15, %v767_v39, %v1268_v17 }
 0x441   :  { %v766_v42 = vsel %vm482_vm0, %v1538_v20, %v749_v40  ;;  %1178 = vmatpush3.msra.mxu1 %v775_v41 }
 0x442   :  { %1179 = vmatprep.subr.mxu1 %v1291_v3  ;;  %v745_v43 = vpop.permute.xlu0 %744  ;;  %v774_v44 = vsel %vm344_vm15, %v766_v42, %v1270_v21 }
 0x443   :  { %1180 = vmatpush3.msra.mxu1 %v774_v44  ;;  %v764_v46 = vsel %vm482_vm0, %v1530_v16, %v745_v43 }
 0x444   :  { %v747_v45 = vpop.permute.xlu1 %746  ;;  %1181 = vmatprep.subr.mxu1 %v1291_v3  ;;  %v772_v49 = vsel %vm344_vm15, %v764_v46, %v1272_v24 }
 0x445   :  { %v765_v22 = vsel %vm482_vm0, %v1534_v18, %v747_v45 }
 0x446   :  { %v741_v47 = vpop.permute.xlu0 %740  ;;  %v773_v48 = vsel %vm344_vm15, %v765_v22, %v1274_v26 }
 0x447   :  { %1182 = vmatpush3.msra.mxu1 %v773_v48  ;;  %v762_v50 = vsel %vm482_vm0, %v1522_v12, %v741_v47 }
 0x448   :  { %v743_v20 = vpop.permute.xlu1 %742  ;;  %1183 = vmatprep.subr.mxu1 %v1291_v3  ;;  %v770_v53 = vsel %vm344_vm15, %v762_v50, %v1276_v28 }
 0x449   :  { %v763_v51 = vsel %vm482_vm0, %v1526_v14, %v743_v20  ;;  %1184 = vmatpush3.msra.mxu1 %v772_v49 }
 0x44a   :  { %1185 = vmatprep.subr.mxu1 %v1291_v3  ;;  %v737_v16 = vpop.permute.xlu0 %736  ;;  %v771_v18 = vsel %vm344_vm15, %v763_v51, %v1278_v30 }
 0x44b   :  { %1186 = vmatpush3.msra.mxu1 %v771_v18  ;;  %v760_v54 = vsel %vm482_vm0, %v1514_v7, %v737_v16  ;;  %v28_v7 = vld [vmem:[%s1651_s0 + $0x40] sm:$0x3] }
 0x44c   :  { %v739_v52 = vpop.permute.xlu1 %738  ;;  %1187 = vmatprep.subr.mxu1 %v1291_v3  ;;  %v768_v56 = vsel %vm344_vm15, %v760_v54, %v1280_v33  ;;  %56 = vperm.xlu0 %1231, %v28_v7  }
 0x44d   :  { %v761_v12 = vsel %vm482_vm0, %v1518_v9, %v739_v52  ;;  %1188 = vmatpush3.msra.mxu1 %v770_v53 }
 0x44e   :  { %1189 = vmatprep.subr.mxu1 %v1291_v3  ;;  %v769_v14 = vsel %vm344_vm15, %v761_v12, %v1282_v35 }
 0x44f   :  { %1190 = vmatpush3.msra.mxu1 %v769_v14 }
 0x450   :  { %1191 = vmatprep.subr.mxu1 %v1291_v3  ;;  %1234 = vset.pattern.permute.xlu0 %v1295_v31 }
 0x451   :  { %1192 = vmatpush3.msra.mxu1 %v768_v56 }
 0x452   :  { %1194 = vmatmul.mubr.msk.f32.vlgmr.msra.gmra.mxu1 %vm344_vm15, %v776_v55  ;;  %1196 = vmatprep.subr.mxu1 %v1291_v3 }
 0x453   :  { %1200 = vmatprep.mubr.msk.f32.mxu1 %vm1293_vm1, %v1291_v3 }
 0x4c7   :  { %v57_v59 = vpop.permute.xlu0 %56 }
 0x4c8   :  { %vm66_vm2 = vcmp.eq.s32.totalorder %v1447_v38, %v57_v59 }
 0x512   :  { %v846_v9 = vpop.f32.mrf.mxu1 }
 0x513   :  { %852 = vperm.xlu1 %1230, %v846_v9  }
 0x514   :  { %v1195_v57 = vpop.f32.mrf.mxu1 }
 0x517   :  { %1232 = vset.pattern.permute.xlu1 %v1292_v10 }
 0x518   :  { %92 = vperm.xlu1 %1232, %v28_v7  }
 0x51c   :  { %1233 = vset.pattern.permute.xlu1 %v1289_v0 }
 0x51d   :  { %137 = vperm.xlu1 %1233, %v28_v7  }
 0x58e   :  { %v853_v58 = vpop.permute.xlu1 %852 }
 0x58f   :  { %1283 = vrcp.f32 %v853_v58 }
 0x593   :  { %v93_v60 = vpop.permute.xlu1 %92 }
 0x594   :  { %vm102_vm1 = vcmp.eq.s32.totalorder %v1447_v38, %v93_v60 }
 0x595   :  { %vm111_vm3 = vmor %vm66_vm2, %vm102_vm1 }
 0x598   :  { %v138_v61 = vpop.permute.xlu1 %137 }
 0x599   :  { %vm147_vm4 = vcmp.eq.s32.totalorder %v1447_v38, %v138_v61 }
 0x59a   :  { %vm156_vm5 = vmor %vm111_vm3, %vm147_vm4 }
 0x59b   :  { %v972_v62 = vsel %vm156_vm5, 1.0, %v1291_v3 }
 0x59c   :  { %v1284_v10 = vpop.eup %1283  ;;  %1127 = vmatmul.mubr.msk.f32.gmra.mxu0 %vm189_vm10, %v972_v62  ;;  %vm941_vm10 = vcmask 254976  }
 0x59d   :  { %v856_v0 = vmul.f32 %v1284_v10, %v846_v9 }
 0x59f   :  { %858 = vrot.lane.b32.xlu0 %v856_v0, %s1294_s2 }
 0x611   :  { %v859_v63 = vpop.permute.xlu0 %858 }
 0x612   :  { %1197 = vmatpush3.msra.mxu1 %v859_v63 }
 0x613   :  { %1198 = vmatprep.subr.mxu1 %v1291_v3 }
 0x614   :  { %1199 = vmatpush3.msra.mxu1 %v846_v9 }
 0x615   :  { %1201 = vmatmul.mubr.msk.f32.vlgmr.msra.gmra.mxu1 %vm862_vm6, %v861_v1 }
 0x65c   :  { %v327_v38 = vpop.f32.mrf.mxu0 }
 0x65e   :  { %v1128_v2 = vpop.f32.mrf.mxu0 }
 0x6d5   :  { %v932_v4 = vpop.f32.mrf.mxu1 }
 0x6d6   :  { %v937_v5 = vrot.slane %v932_v4, 2 }
 0x6d7   :  { %v1202_v6 = vpop.f32.mrf.mxu1 }
 0x6d8   :  { %v939_v8 = vadd.f32 %v937_v5, %v327_v38 }
 0x6da   :  { %952 = vrot.lane.b32.xlu0 %v939_v8, %s1296_s15  ;;  %v940_v11 = vmul.f32 %v939_v8, %v932_v4 }
 0x6dc   :  { %v942_v13 = vsel %vm941_vm10, %v940_v11, 0.0 }
 0x6dd   :  { %943 = vadd.xlane.f32.xlu1 %v942_v13 }
 0x74c   :  { %v953_v3 = vpop.permute.xlu0 %952 }
 0x74d   :  { %v955_v24 = vsel %vm482_vm0, %v932_v4, %v953_v3 }
 0x766   :  { %v944_v15 = vpop.xlane.xlu1 %943 }
 0x767   :  { %v1010_v17 = vmul.f32 -1.442695, %v944_v15 }
 0x769   :  { %1285 = vpow2.f32 %v1010_v17 }
 0x776   :  { %v1286_v19 = vpop.eup %1285 }
 0x777   :  { %v948_v21 = vadd.f32 1.0, %v1286_v19 }
 0x779   :  { %1287 = vrcp.f32 %v948_v21 }
 0x786   :  { %v1288_v23 = vpop.eup %1287 }
 0x787   :  { %v956_v25 = vsel %vm344_vm15, %v955_v24, %v1288_v23 }
 0x788   :  { %v958_v26 = vsel %vm957_vm7, %v956_v25, 0.0 }
 0x789   :  { %959 = vst [vmem:[%s1656_s5] sm:$0x3] %v958_v26 }

</bundles_post_ra>
